<compile_context>
chip_gen: v6e
topology: v6e:2x2x1
jax: 0.10.0
libtpu: 0.0.40
codegen_flags: <defaults>
</compile_context>

<pallas_src>
import jax
import jax.numpy as jnp
from jax.experimental import pallas as pl
from jax.experimental.pallas import tpu as pltpu


# ----------------------------------------------------------------------------
# Weight pre-fusion (exact while the backbone stub is linear).
# ----------------------------------------------------------------------------
def _fused_weights(params):
    w_bb = params["w_bb"].astype(jnp.float32)                    # (21, Cin, 3, 3)
    w_hd = params["w_head"].reshape(7, 21).astype(jnp.float32)   # (7, 21)
    w_comb = jnp.einsum("om,mcyx->ocyx", w_hd, w_bb)             # (7, Cin, 3, 3)
    b_eff = (w_hd @ params["b_bb"].astype(jnp.float32)
             + params["b_head"].astype(jnp.float32))             # (7,)
    return w_comb, b_eff


# ----------------------------------------------------------------------------
# Fused forward: in-kernel 3x3 window assembly -> (7,27) dot -> channel softmax.
# ----------------------------------------------------------------------------
def robo_block_net(x_nchw, params, tm=32768):
    N, Cin, H, W = x_nchw.shape
    Hp, Wp = H + 2, W + 2
    Q = Hp * Wp                                   # padded pixels per image
    K = 9 * Cin

    # Host prep: zero-pad conv halo, bf16 cast, flatten padded pixels per image.
    x_flat = jnp.pad(x_nchw, ((0, 0), (0, 0), (1, 1), (1, 1))
                     ).astype(jnp.bfloat16).reshape(N, Cin, Q)

    # Lane-tile / halo geometry.  The 3x3 window needs up to 2*Wp+2 lanes beyond a tile.
    halo_l = 128 * pl.cdiv(2 * Wp + 2, 128)            # halo block, 128-lane aligned
    tm_eff = min(tm, halo_l * pl.cdiv(Q, halo_l))      # clamp for tiny inputs
    tm_eff = halo_l * pl.cdiv(tm_eff, halo_l)          # multiple of halo_l
    ratio = tm_eff // halo_l
    n_blk = pl.cdiv(Q, tm_eff)
    L = n_blk * tm_eff + halo_l                        # +1 halo block of zeros
    x_flat = jnp.pad(x_flat, ((0, 0), (0, 0), (0, L - Q)))

    # Fused (7, 9*Cin) weight; columns ordered (dy, dx, c) to match patch assembly.
    w_comb, b_eff = _fused_weights(params)
    w_eff = jnp.transpose(w_comb, (0, 2, 3, 1)).reshape(7, K).astype(jnp.bfloat16)
    b_eff = b_eff.reshape(7, 1)

    offsets = tuple(dy * Wp + dx for dy in range(3) for dx in range(3))

    def kernel(x_ref, h_ref, w_ref, b_ref, o_ref):
        # x_ref: (1, Cin, tm)     bf16  current lane tile of the flat padded image
        # h_ref: (1, Cin, halo_l) bf16  first lanes of the NEXT tile (window halo)
        # w_ref: (7, 9*Cin)       bf16  fused stub-conv + head weight
        # b_ref: (7, 1)           f32   fused bias
        # o_ref: (1, 7, tm)       bf16  softmax probabilities (channels on sublanes)
        full = jnp.concatenate([x_ref[0], h_ref[0]], axis=1)         # (Cin, tm+halo_l)
        # In-kernel im2col: 9 statically shifted lane windows, rows ordered (dy, dx, c).
        patches = jnp.concatenate(
            [full[:, off:off + tm_eff] for off in offsets], axis=0)   # (9*Cin, tm)
        logits = jnp.dot(w_ref[...], patches,
                         preferred_element_type=jnp.float32) + b_ref[...]  # (7, tm)
        m = jnp.max(logits, axis=0, keepdims=True)                    # (1, tm)
        e = jnp.exp((logits - m).astype(jnp.bfloat16)).astype(jnp.float32)
        denom = jnp.sum(e, axis=0, keepdims=True)                     # (1, tm)
        o_ref[0] = (e * pl.reciprocal(denom, approx=True)).astype(jnp.bfloat16)

    out = pl.pallas_call(
        kernel,
        out_shape=jax.ShapeDtypeStruct((N, 7, n_blk * tm_eff), jnp.bfloat16),
        grid_spec=pltpu.PrefetchScalarGridSpec(
            num_scalar_prefetch=0,
            grid=(N, n_blk),
            in_specs=[
                pl.BlockSpec((1, Cin, tm_eff), lambda n, j: (n, 0, j)),
                pl.BlockSpec((1, Cin, halo_l), lambda n, j: (n, 0, (j + 1) * ratio)),
                pl.BlockSpec((7, K), lambda n, j: (0, 0)),
                pl.BlockSpec((7, 1), lambda n, j: (0, 0)),
            ],
            out_specs=pl.BlockSpec((1, 7, tm_eff), lambda n, j: (n, 0, j)),
        ),
        compiler_params=pltpu.CompilerParams(
            dimension_semantics=("parallel", "parallel"),
            # Comfortable on every gen (v5e default scoped limit is only 16 MiB).
            vmem_limit_bytes=32 * 1024 * 1024,
        ),
    )(x_flat, x_flat, w_eff, b_eff)

    # Drop padded rows/cols, back to NCHW (N, 7, H, W); f32 for downstream consumers.
    out = out[:, :, :Q].reshape(N, 7, Hp, Wp)[:, :, :H, :W]
    return out.astype(jnp.float32)


def init_params():
    k = jax.random.PRNGKey(0)
    k1, k2, k3, k4 = jax.random.split(k, 4)
    return {
        # backbone stub 3x3 conv: 3 -> 21 (stands in for fcn_resnet101 'out')
        "w_bb": 0.1 * jax.random.normal(k1, (21, 3, 3, 3), jnp.float32),
        "b_bb": 0.1 * jax.random.normal(k2, (21,), jnp.float32),
        # output head Conv2d(21, 7, 1), as in the PyTorch module
        "w_head": 0.1 * jax.random.normal(k3, (7, 21, 1, 1), jnp.float32),
        "b_head": 0.1 * jax.random.normal(k4, (7,), jnp.float32),
    }


def _reference(x_nchw, params):
    """Pure-JAX reference of the same (stubbed, pre-fused) forward, emulating the
    kernel's bf16 rounding of inputs, fused weights, and the exp argument."""
    w_comb, b_eff = _fused_weights(params)
    x_bf = x_nchw.astype(jnp.bfloat16).astype(jnp.float32)
    w_bf = w_comb.astype(jnp.bfloat16).astype(jnp.float32)        # (7, Cin, 3, 3) OIHW
    logits = jax.lax.conv_general_dilated(
        x_bf, w_bf, window_strides=(1, 1), padding=((1, 1), (1, 1)),
        dimension_numbers=("NCHW", "OIHW", "NCHW"))
    logits = logits + b_eff.reshape(1, 7, 1, 1)
    m = jnp.max(logits, axis=1, keepdims=True)
    e = jnp.exp((logits - m).astype(jnp.bfloat16).astype(jnp.float32))
    return e / jnp.sum(e, axis=1, keepdims=True)


if __name__ == "__main__":
    key = jax.random.PRNGKey(0)
    x = jax.random.normal(key, (2, 3, 16, 16), jnp.float32)       # NCHW, like PyTorch
    params = init_params()

    fwd = jax.jit(robo_block_net)
    out = jax.block_until_ready(fwd(x, params))

    ref = _reference(x, params)
    assert out.shape == (2, 7, 16, 16)
    # bf16 input/weights/exp/output + approx reciprocal -> loosened tolerances
    assert jnp.allclose(out, ref, atol=2e-2, rtol=2e-2)
    # softmax over the channel dim sums to ~1
    assert jnp.allclose(jnp.sum(out, axis=1), 1.0, atol=2e-2)

    print("KERNEL_OK")
</pallas_src>

<mosaic_0001>
module attributes {stable_mosaic.version = 11 : i64} {
  func.func @kernel(%arg0: i32, %arg1: i32, %arg2: memref<1x3x384xbf16, #tpu.memory_space<vmem>>, %arg3: memref<1x3x128xbf16, #tpu.memory_space<vmem>>, %arg4: memref<7x27xbf16, #tpu.memory_space<vmem>>, %arg5: memref<7x1xf32, #tpu.memory_space<vmem>>, %arg6: memref<1x7x384xbf16, #tpu.memory_space<vmem>>) attributes {dimension_semantics = [#tpu.dimension_semantics<parallel>, #tpu.dimension_semantics<parallel>], iteration_bounds = array<i64: 2, 1>, scalar_prefetch = 0 : i64, scratch_operands = 0 : i64, tpu.core_type = #tpu.core_type<tc>, window_params = [{transform_indices = @transform_0, window_bounds = array<i64: 1, 3, 384>}, {transform_indices = @transform_1, window_bounds = array<i64: 1, 3, 128>}, {pipeline_mode = #tpu.pipeline_mode<synchronous>, transform_indices = @transform_2, window_bounds = array<i64: 7, 27>}, {pipeline_mode = #tpu.pipeline_mode<synchronous>, transform_indices = @transform_3, window_bounds = array<i64: 7, 1>}, {transform_indices = @transform_4, window_bounds = array<i64: 1, 7, 384>}]} {
    %c0 = arith.constant 0 : index
    %c0_0 = arith.constant 0 : index
    %c0_1 = arith.constant 0 : index
    %0 = vector.load %arg2[%c0, %c0_0, %c0_1] : memref<1x3x384xbf16, #tpu.memory_space<vmem>>, vector<1x3x384xbf16>
    %1 = vector.shape_cast %0 : vector<1x3x384xbf16> to vector<3x384xbf16>
    %c0_2 = arith.constant 0 : index
    %c0_3 = arith.constant 0 : index
    %c0_4 = arith.constant 0 : index
    %2 = vector.load %arg3[%c0_2, %c0_3, %c0_4] : memref<1x3x128xbf16, #tpu.memory_space<vmem>>, vector<1x3x128xbf16>
    %3 = vector.shape_cast %2 : vector<1x3x128xbf16> to vector<3x128xbf16>
    %4 = tpu.concatenate %1, %3 in 1 : vector<3x384xbf16>, vector<3x128xbf16> -> vector<3x512xbf16>
    %5 = vector.extract_strided_slice %4 {offsets = [0, 0], sizes = [3, 384], strides = [1, 1]} : vector<3x512xbf16> to vector<3x384xbf16>
    %6 = vector.extract_strided_slice %4 {offsets = [0, 1], sizes = [3, 384], strides = [1, 1]} : vector<3x512xbf16> to vector<3x384xbf16>
    %7 = vector.extract_strided_slice %4 {offsets = [0, 2], sizes = [3, 384], strides = [1, 1]} : vector<3x512xbf16> to vector<3x384xbf16>
    %8 = vector.extract_strided_slice %4 {offsets = [0, 18], sizes = [3, 384], strides = [1, 1]} : vector<3x512xbf16> to vector<3x384xbf16>
    %9 = vector.extract_strided_slice %4 {offsets = [0, 19], sizes = [3, 384], strides = [1, 1]} : vector<3x512xbf16> to vector<3x384xbf16>
    %10 = vector.extract_strided_slice %4 {offsets = [0, 20], sizes = [3, 384], strides = [1, 1]} : vector<3x512xbf16> to vector<3x384xbf16>
    %11 = vector.extract_strided_slice %4 {offsets = [0, 36], sizes = [3, 384], strides = [1, 1]} : vector<3x512xbf16> to vector<3x384xbf16>
    %12 = vector.extract_strided_slice %4 {offsets = [0, 37], sizes = [3, 384], strides = [1, 1]} : vector<3x512xbf16> to vector<3x384xbf16>
    %13 = vector.extract_strided_slice %4 {offsets = [0, 38], sizes = [3, 384], strides = [1, 1]} : vector<3x512xbf16> to vector<3x384xbf16>
    %14 = tpu.concatenate %5, %6, %7, %8, %9, %10, %11, %12, %13 in 0 : vector<3x384xbf16>, vector<3x384xbf16>, vector<3x384xbf16>, vector<3x384xbf16>, vector<3x384xbf16>, vector<3x384xbf16>, vector<3x384xbf16>, vector<3x384xbf16>, vector<3x384xbf16> -> vector<27x384xbf16>
    %c0_5 = arith.constant 0 : index
    %c0_6 = arith.constant 0 : index
    %15 = vector.load %arg4[%c0_5, %c0_6] : memref<7x27xbf16, #tpu.memory_space<vmem>>, vector<7x27xbf16>
    %cst = arith.constant dense<0.000000e+00> : vector<7x384xf32>
    %16 = tpu.matmul %15, %14, %cst {dimension_numbers = #tpu.dot_dimension_numbers<[1], [0], [0], [1], [0, 0, 1, 1], [], []>} : vector<7x27xbf16>, vector<27x384xbf16>, vector<7x384xf32> -> vector<7x384xf32>
    %c0_7 = arith.constant 0 : index
    %c0_8 = arith.constant 0 : index
    %17 = vector.load %arg5[%c0_7, %c0_8] : memref<7x1xf32, #tpu.memory_space<vmem>>, vector<7x1xf32>
    %18 = vector.broadcast %17 : vector<7x1xf32> to vector<7x384xf32>
    %19 = arith.addf %16, %18 : vector<7x384xf32>
    %cst_9 = arith.constant dense<0xFF800000> : vector<384xf32>
    %20 = vector.multi_reduction <maximumf>, %19, %cst_9 [0] : vector<7x384xf32> to vector<384xf32>
    %21 = vector.shape_cast %20 : vector<384xf32> to vector<1x384xf32>
    %22 = vector.broadcast %21 : vector<1x384xf32> to vector<7x384xf32>
    %23 = arith.subf %19, %22 : vector<7x384xf32>
    %24 = arith.truncf %23 : vector<7x384xf32> to vector<7x384xbf16>
    %25 = math.exp %24 : vector<7x384xbf16>
    %26 = arith.extf %25 : vector<7x384xbf16> to vector<7x384xf32>
    %cst_10 = arith.constant dense<0.000000e+00> : vector<384xf32>
    %27 = vector.multi_reduction <add>, %26, %cst_10 [0] : vector<7x384xf32> to vector<384xf32>
    %28 = vector.shape_cast %27 : vector<384xf32> to vector<1x384xf32>
    %29 = tpu.reciprocal %28 {approx = true} : vector<1x384xf32> -> vector<1x384xf32>
    %30 = vector.broadcast %29 : vector<1x384xf32> to vector<7x384xf32>
    %31 = arith.mulf %26, %30 : vector<7x384xf32>
    %32 = arith.truncf %31 : vector<7x384xf32> to vector<7x384xbf16>
    %c0_11 = arith.constant 0 : index
    %c0_12 = arith.constant 0 : index
    %c0_13 = arith.constant 0 : index
    %33 = vector.load %arg6[%c0_11, %c0_12, %c0_13] : memref<1x7x384xbf16, #tpu.memory_space<vmem>>, vector<1x7x384xbf16>
    %34 = vector.shape_cast %33 : vector<1x7x384xbf16> to vector<7x384xbf16>
    %35 = vector.shape_cast %32 : vector<7x384xbf16> to vector<1x7x384xbf16>
    tpu.vector_store %arg6[%c0_11, %c0_12, %c0_13], %35 {strides = array<i32>} : memref<1x7x384xbf16, #tpu.memory_space<vmem>>, vector<1x7x384xbf16>,
    return
  }
  func.func @transform_0(%arg0: i32, %arg1: i32) -> (i32, i32, i32) {
    %c0_i32 = arith.constant 0 : i32
    %c0_i32_0 = arith.constant 0 : i32
    return %arg0, %c0_i32, %arg1 : i32, i32, i32
  }
  func.func @transform_1(%arg0: i32, %arg1: i32) -> (i32, i32, i32) {
    %c1_i32 = arith.constant 1 : i32
    %0 = arith.addi %arg1, %c1_i32 : i32
    %c3_i32 = arith.constant 3 : i32
    %1 = arith.muli %0, %c3_i32 : i32
    %c0_i32 = arith.constant 0 : i32
    %c0_i32_0 = arith.constant 0 : i32
    return %arg0, %c0_i32, %1 : i32, i32, i32
  }
  func.func @transform_2(%arg0: i32, %arg1: i32) -> (i32, i32) {
    %c0_i32 = arith.constant 0 : i32
    %c0_i32_0 = arith.constant 0 : i32
    %c0_i32_1 = arith.constant 0 : i32
    return %c0_i32, %c0_i32_0 : i32, i32
  }
  func.func @transform_3(%arg0: i32, %arg1: i32) -> (i32, i32) {
    %c0_i32 = arith.constant 0 : i32
    %c0_i32_0 = arith.constant 0 : i32
    %c0_i32_1 = arith.constant 0 : i32
    return %c0_i32, %c0_i32_0 : i32, i32
  }
  func.func @transform_4(%arg0: i32, %arg1: i32) -> (i32, i32, i32) {
    %c0_i32 = arith.constant 0 : i32
    %c0_i32_0 = arith.constant 0 : i32
    return %arg0, %c0_i32, %arg1 : i32, i32, i32
  }
}

</mosaic_0001>

<bundles_post_ra>
// kernel: robo_block_net.1
= control target key start
LH: loop header
LB: loop body
LE: loop exit
PB: predicated region body
PF: predicated region fallthrough
CT: control target
= control target key end

     0   :  { %s1049_s15 = smov 0   ;;  %s1051_s16 = smov 0   ;;  %s1318_s0 = inlined_call_operand.vmem [shape: bf16[2,3,512], index: 0, kind: input, shape index: {}, may-alias: {0,1}]   ;;  %s1319_s1 = inlined_call_operand.vmem [shape: bf16[2,3,512], index: 1, kind: input, shape index: {}, may-alias: {0,1}]   ;;  %s1320_s2 = inlined_call_operand.vmem [shape: bf16[7,27], index: 2, kind: input, shape index: {}]   ;;  %s1321_s3 = inlined_call_operand.vmem [shape: f32[7,1], index: 3, kind: input, shape index: {}]   ;;  %s1322_s4 = inlined_call_operand.vmem [shape: bf16[2,7,384], index: 4, kind: output, shape index: {}]  }
   0x1   :  { %s1053_s17 = smov 0  }
   0x2 LB: > { %s26_s18 = sadd.s32 1, %s1005_s16  ;;  %p900_p0 = scmp.ge.s32.totalorder %s1009_s17, 1  ;;  %s1009_s17 = sphi %s1053_s17, %s14_s17   ;;  %s1005_s16 = sphi %s1051_s16, %s1332_s16   ;;  %s1001_s15 = sphi %s1049_s15, %s1331_s15  }
   0x3   : > { %p28_p1 = scmp.ge.s32.totalorder %s26_s18, 2  ;;  %p214_p2 = scmp.lt.s32.totalorder %s1009_s17, 3 }
   0x5   : > { %s1334_s18 = smov (%p28_p1, %s26_s18), 0  ;;  %p215_p3 = pnand %p900_p0, %p214_p2 }
   0x6   : > { %p267_p4 = scmp.lt.s32.totalorder (!%p215_p3), %s1001_s15, 1  ;;  %s1012_s24 = smov (!%p215_p3), 92  }
   0x7   : > { %218 = sbr.rel (%p215_p3) target bundleno = 479 (0x1df), region = 36  ;;  %s1013_s28 = smov (!%p215_p3), 108  }
   0x8   : > { %s1014_s29 = smov (!%p215_p3), 90   ;;  %s1015_s30 = smov (!%p215_p3), 91  }
   0x9   : > { %s1016_s5 = smov (!%p215_p3), 127   ;;  %s1018_s6 = smov (!%p215_p3), 126  }
   0xa   : > { %s1019_s7 = smov (!%p215_p3), 110   ;;  %s1020_s8 = smov (!%p215_p3), 109  }
   0xc   : > { %v310_v0 = vlaneseq  ;;  %v1011_v1 = vmov 1983009808   ;;  %s1336_s15 = smov (!%p267_p4, %s1001_s15), 1  ;;  %v1017_v56 = vmov 0.0   ;;  %vm1022_vm0 = vmmov 0  }
   0xd   : > { %v308_v2 = vunpack.c.l.s4 %v1011_v1  ;;  %s912_s19 = sshll.u32 %s1336_s15, 3  ;;  %921 = vmatprep.subr.bf16.mxu1 %v1017_v56  ;;  %925 = vmatprep.mubr.msk.bf16.mxu1 %vm1022_vm0, %v1017_v56  ;;  %vm456_vm1 = vcmask 883712   ;;  %vm544_vm2 = vcmask 1044480   ;;  %vm502_vm3 = vcmask 744448   ;;  %s929_s13 = smul.u32 12, %s1336_s15 }
   0xe   : > { %v311_v3 = vshrl.u32 %v310_v0, 7  ;;  %s274_s22 = scalar_lea.vmem %s1318_s0, %s912_s19  ;;  %s914_s23 = sadd.s32 6, %s912_s19  ;;  %vm531_vm4 = vcmask 1042432   ;;  %vm583_vm5 = vsmask.f32 2304  ;;  %vm478_vm6 = vcmask 752640  }
   0xf   : > { %v309_v4 = vunpack.c.0.s8 %v308_v2  ;;  %v303_v6 = vld [vmem:[%s274_s22] sm:$0x3f]  ;;  %s289_s27 = scalar_lea.vmem %s1319_s1, %s914_s23  ;;  %vm569_vm7 = vcmask 1040384   ;;  %vm550_vm8 = vcmask 1045504   ;;  %vm1211_vm9 = vmand %vm531_vm4, %vm583_vm5  ;;  %vm521_vm10 = vcmask 736256   ;;  %s300_s20 = scalar_lea.vmem %s1322_s4, %s929_s13 }
  0x10   : > { %v306_v8 = vcombine.high %v303_v6, %v303_v6  ;;  %v1115_v25 = vld [vmem:[%s289_s27] sm:$0x3]  ;;  %vm588_vm11 = vcmask 1043456   ;;  %vm365_vm12 = vcmask 1039360   ;;  %vm525_vm13 = vcmask 1041408  }
  0x11   : > { %v312_v5 = vsub.s32 %v309_v4, %v311_v3  ;;  %v1119_v27 = vshll.u32 %v1115_v25, 16  ;;  %v1130_v32 = vshrl.u32 %v1115_v25, 16  ;;  %v469_v44 = vrot.slane %v1115_v25, 7 }
  0x12   : > { %v512_v61 = vrot.slane %v1115_v25, 4  ;;  %vm526_vm14 = vsmask.f32 1280  ;;  %vm385_vm15 = vcmask 1031168   ;;  %vm545_vm0 = vsmask.f32 4352 }
  0x13   : > { %v1073_v7 = vrot.slane %v303_v6, %v312_v5  ;;  %v1090_v16 = vrot.slane %v306_v8, %v312_v5  ;;  %v435_v33 = vrot.slane %v1119_v27, 1  ;;  %v491_v52 = vrot.slane %v1130_v32, 5 }
  0x14   : > { %v492_v53 = vrot.slane %v1119_v27, 6  ;;  %v352_v5 = vrot.slane %v1130_v32, 6  ;;  %v355_v6 = vrot.slane %v1119_v27, 7  ;;  %vm409_vm5 = vcmask 900096  }
  0x15   : > { %v466_v9 = vrot.slane %v1073_v7, 7  ;;  %v1077_v10 = vshrl.u32 %v1073_v7, 16  ;;  %v1080_v11 = vshll.u32 %v1073_v7, 16  ;;  %v1084_v12 = vcombine.high %v1073_v7, %v1073_v7 }
  0x16   : > { %v1110_v23 = vshrl.u32 %v1090_v16, 16  ;;  %v1113_v24 = vshll.u32 %v1090_v16, 16  ;;  %v468_v26 = vrot.slane %v1090_v16, 7  ;;  %v439_v38 = vor.u32 %v435_v33, %v1130_v32 }
  0x17   : > { %470 = vrot.lane.b32.xlu1 %v466_v9, %s1012_s24  ;;  %v432_v13 = vrot.slane %v1080_v11, 1  ;;  %v482_v14 = vrot.slane %v1077_v10, 5  ;;  %v483_v15 = vrot.slane %v1080_v11, 6  ;;  %v1093_v17 = vshll.u32 %v1084_v12, 16 }
  0x18   : > { %v467_v19 = vrot.slane %v1084_v12, 7  ;;  %v1103_v20 = vshrl.u32 %v1084_v12, 16  ;;  %v488_v29 = vrot.slane %v1110_v23, 5  ;;  %v489_v30 = vrot.slane %v1113_v24, 6 }
  0x19   : > { %v436_v18 = vor.u32 %v432_v13, %v1077_v10  ;;  %v484_v21 = vor.u32 %v483_v15, %v482_v14  ;;  %v433_v22 = vrot.slane %v1093_v17, 1  ;;  %v434_v31 = vrot.slane %v1113_v24, 1 }
  0x1a   : > { %v490_v34 = vor.u32 %v489_v30, %v488_v29  ;;  %v485_v36 = vrot.slane %v1103_v20, 5  ;;  %v486_v37 = vrot.slane %v1093_v17, 6  ;;  %v509_v40 = vrot.slane %v1073_v7, 4 }
  0x1b   : > { %448 = vrot.lane.b32.xlu0 %v436_v18, %s1013_s28  ;;  %515 = vrot.lane.b32.xlu1 %v1084_v12, %s1014_s29  ;;  %v437_v28 = vor.u32 %v433_v22, %v1103_v20  ;;  %v438_v35 = vor.u32 %v434_v31, %v1110_v23  ;;  %v511_v41 = vrot.slane %v1090_v16, 4  ;;  %v344_v42 = vrot.slane %v1110_v23, 6 }
  0x1c   : > { %v487_v39 = vor.u32 %v486_v37, %v485_v36  ;;  %v347_v43 = vrot.slane %v1113_v24, 7  ;;  %v336_v45 = vrot.slane %v1103_v20, 6  ;;  %v339_v47 = vrot.slane %v1093_v17, 7 }
  0x1d   : > { %v328_v48 = vrot.slane %v1077_v10, 6  ;;  %v331_v49 = vrot.slane %v1080_v11, 7  ;;  %v493_v54 = vor.u32 %v492_v53, %v491_v52  ;;  %v375_v55 = vrot.slane %v1090_v16, 5 }
  0x1e   : > { %v348_v46 = vor.u32 %v347_v43, %v344_v42  ;;  %v340_v50 = vor.u32 %v339_v47, %v336_v45  ;;  %v374_v57 = vrot.slane %v1084_v12, 5  ;;  %v373_v58 = vrot.slane %v1073_v7, 5 }
  0x1f   : > { %494 = vrot.lane.b32.xlu0 %v484_v21, %s1015_s30  ;;  %472 = vrot.lane.b32.xlu1 %v467_v19, %s1012_s24  ;;  %v332_v51 = vor.u32 %v331_v49, %v328_v48  ;;  %v395_v59 = vrot.slane %v1110_v23, 3  ;;  %v396_v60 = vrot.slane %v1113_v24, 4  ;;  %v392_v62 = vrot.slane %v1103_v20, 3 }
  0x20   : > { %v393_v0 = vrot.slane %v1093_v17, 4  ;;  %v389_v1 = vrot.slane %v1077_v10, 3  ;;  %v390_v2 = vrot.slane %v1080_v11, 4  ;;  %v356_v8 = vor.u32 %v355_v6, %v352_v5 }
  0x21   : > { %v397_v63 = vor.u32 %v396_v60, %v395_v59  ;;  %v418_v9 = vrot.slane %v1090_v16, 2  ;;  %v417_v10 = vrot.slane %v1084_v12, 2  ;;  %v416_v14 = vrot.slane %v1073_v7, 2 }
  0x22   : > { %v394_v3 = vor.u32 %v393_v0, %v392_v62  ;;  %v391_v4 = vor.u32 %v390_v2, %v389_v1  ;;  %v398_v15 = vrot.slane %v1130_v32, 3  ;;  %v399_v18 = vrot.slane %v1119_v27, 4 }
  0x23   : > { %450 = vrot.lane.b32.xlu0 %v437_v28, %s1013_s28  ;;  %474 = vrot.lane.b32.xlu1 %v468_v26, %s1012_s24  ;;  %v376_v19 = vrot.slane %v1115_v25, 5  ;;  %v1021_v21 = vmov 0   ;;  %v967_v23 = vpack.i.bf16 %v434_v31, %v433_v22  ;;  %v419_v26 = vrot.slane %v1115_v25, 2  ;;  %v599_v28 = vld [vmem:[%s1321_s3] sm:$0x7f] }
  0x24   : > { %v400_v20 = vor.u32 %v399_v18, %v398_v15  ;;  %650 = vmatprep.mubr.bf16.mxu0 %v1021_v21  ;;  %972 = vset.pattern.permute.xlu1 %v1021_v21  ;;  %v1023_v36 = vmov 65535  }
  0x25   : > { %973 = vset.pattern.permute.xlu0 %v1021_v21  ;;  %v610_v37 = vsel %vm544_vm2, 4294967295, %v1023_v36 }
  0x27   : > { %498 = vrot.lane.b32.xlu1 %v490_v34, %s1015_s30  ;;  %452 = vrot.lane.b32.xlu0 %v438_v35, %s1013_s28 }
  0x2b   : > { %454 = vrot.lane.b32.xlu1 %v439_v38, %s1013_s28  ;;  %496 = vrot.lane.b32.xlu0 %v487_v39, %s1015_s30 }
  0x2f   : > { %513 = vrot.lane.b32.xlu1 %v509_v40, %s1014_s29  ;;  %517 = vrot.lane.b32.xlu0 %v511_v41, %s1014_s29 }
  0x33   : > { %476 = vrot.lane.b32.xlu0 %v469_v44, %s1012_s24  ;;  %361 = vrot.lane.b32.xlu1 %v348_v46, %s1016_s5  ;;  %v611_v46 = vsel %vm550_vm8, %v610_v37, 0 }
  0x37   : > { %359 = vrot.lane.b32.xlu0 %v340_v50, %s1016_s5  ;;  %357 = vrot.lane.b32.xlu1 %v332_v51, %s1016_s5 }
  0x3b   : > { %500 = vrot.lane.b32.xlu0 %v493_v54, %s1015_s30  ;;  %381 = vrot.lane.b32.xlu1 %v375_v55, %s1018_s6 }
  0x3f   : > { %379 = vrot.lane.b32.xlu0 %v374_v57, %s1018_s6  ;;  %377 = vrot.lane.b32.xlu1 %v373_v58, %s1018_s6 }
  0x43   : > { %519 = vrot.lane.b32.xlu0 %v512_v61, %s1014_s29  ;;  %405 = vrot.lane.b32.xlu1 %v397_v63, %s1019_s7 }
  0x47   : > { %403 = vrot.lane.b32.xlu0 %v394_v3, %s1019_s7  ;;  %401 = vrot.lane.b32.xlu1 %v391_v4, %s1019_s7 }
  0x4b   : > { %363 = vrot.lane.b32.xlu0 %v356_v8, %s1016_s5  ;;  %424 = vrot.lane.b32.xlu1 %v418_v9, %s1020_s8 }
  0x4f   : > { %422 = vrot.lane.b32.xlu0 %v417_v10, %s1020_s8  ;;  %420 = vrot.lane.b32.xlu1 %v416_v14, %s1020_s8 }
  0x53   : > { %383 = vrot.lane.b32.xlu0 %v376_v19, %s1018_s6  ;;  %407 = vrot.lane.b32.xlu1 %v400_v20, %s1019_s7 }
  0x57   : > { %968 = vrot.lane.b32.xlu0 %v967_v23, %s1013_s28  ;;  %426 = vrot.lane.b32.xlu1 %v419_v26, %s1020_s8 }
  0x5b   : > { %440 = vrot.lane.b32.xlu0 %v432_v13, %s1013_s28  ;;  %602 = vperm.xlu1 %972, %v599_v28  }
  0x5f   : > { %446 = vrot.lane.b32.xlu0 %v435_v33, %s1013_s28 }
  0x89   : > { %v471_v17 = vpop.permute.xlu1 %470 }
  0x8d   : > { %v449_v22 = vpop.permute.xlu0 %448  ;;  %v516_v24 = vpop.permute.xlu1 %515 }
  0x91   : > { %v495_v25 = vpop.permute.xlu0 %494  ;;  %v473_v29 = vpop.permute.xlu1 %472 }
  0x92   : > { %v479_v41 = vsel %vm478_vm6, %v471_v17, %v473_v29 }
  0x95   : > { %v451_v30 = vpop.permute.xlu0 %450  ;;  %v475_v31 = vpop.permute.xlu1 %474 }
  0x96   : > { %v460_v27 = vsel %vm456_vm1, %v449_v22, %v451_v30  ;;  %v480_v33 = vsel %vm478_vm6, %v473_v29, %v475_v31 }
  0x97   : > { %v572_v42 = vsel %vm569_vm7, %v460_v27, %v479_v41 }
  0x99   : > { %v499_v32 = vpop.permute.xlu1 %498  ;;  %v453_v34 = vpop.permute.xlu0 %452 }
  0x9a   : > { %v461_v35 = vsel %vm456_vm1, %v451_v30, %v453_v34 }
  0x9b   : > { %v576_v43 = vsel %vm569_vm7, %v461_v35, %v480_v33 }
  0x9d   : > { %v455_v11 = vpop.permute.xlu1 %454  ;;  %v497_v13 = vpop.permute.xlu0 %496 }
  0x9e   : > { %v503_v39 = vsel %vm502_vm3, %v495_v25, %v497_v13  ;;  %v504_v40 = vsel %vm502_vm3, %v497_v13, %v499_v32  ;;  %v462_v2 = vsel %vm456_vm1, %v453_v34, %v455_v11 }
  0x9f   : > { %v585_v47 = vsel %vm1211_vm9, %v572_v42, %v503_v39  ;;  %v586_v50 = vsel %vm1211_vm9, %v576_v43, %v504_v40 }
  0xa1   : > { %v514_v44 = vpop.permute.xlu1 %513  ;;  %v518_v45 = vpop.permute.xlu0 %517 }
  0xa2   : > { %v522_v48 = vsel %vm521_vm10, %v514_v44, %v516_v24  ;;  %v523_v49 = vsel %vm521_vm10, %v516_v24, %v518_v45 }
  0xa3   : > { %v594_v51 = vsel %vm588_vm11, %v586_v50, %v523_v49  ;;  %v591_v52 = vsel %vm588_vm11, %v585_v47, %v522_v48 }
  0xa4   : > { %v614_v53 = vand.u32 %v611_v46, %v594_v51  ;;  %v612_v54 = vand.u32 %v611_v46, %v591_v52 }
  0xa5   : > { %v477_v55 = vpop.permute.xlu0 %476  ;;  %v362_v57 = vpop.permute.xlu1 %361 }
  0xa6   : > { %630 = vmatprep.subr.bf16.mxu0 %v614_v53  ;;  %v481_v0 = vsel %vm478_vm6, %v475_v31, %v477_v55  ;;  %vm428_vm6 = vcmask 891904  }
  0xa7   : > { %631 = vmatpush1.bf16.msra.mxu0 %v612_v54  ;;  %v580_v3 = vsel %vm569_vm7, %v462_v2, %v481_v0  ;;  %vm563_vm7 = vcmask 1047552  }
  0xa9   : > { %v360_v58 = vpop.permute.xlu0 %359  ;;  %v358_v59 = vpop.permute.xlu1 %357 }
  0xaa   : > { %v367_v26 = vsel %vm365_vm12, %v360_v58, %v362_v57  ;;  %v366_v25 = vsel %vm365_vm12, %v358_v59, %v360_v58 }
  0xad   : > { %v501_v60 = vpop.permute.xlu0 %500  ;;  %v382_v61 = vpop.permute.xlu1 %381 }
  0xae   : > { %v505_v1 = vsel %vm502_vm3, %v499_v32, %v501_v60  ;;  %vm1238_vm3 = vmand %vm525_vm13, %vm526_vm14 }
  0xaf   : > { %v587_v6 = vsel %vm1211_vm9, %v580_v3, %v505_v1  ;;  %vm564_vm9 = vsmask.f32 7424  ;;  %v529_v24 = vsel %vm1238_vm3, %v1084_v12, %v367_v26  ;;  %v528_v35 = vsel %vm1238_vm3, %v1073_v7, %v366_v25 }
  0xb1   : > { %v380_v62 = vpop.permute.xlu0 %379  ;;  %v378_v63 = vpop.permute.xlu1 %377 }
  0xb2   : > { %v387_v17 = vsel %vm385_vm15, %v380_v62, %v382_v61  ;;  %v386_v31 = vsel %vm385_vm15, %v378_v63, %v380_v62 }
  0xb3   : > { %v538_v30 = vsel %vm531_vm4, %v529_v24, %v387_v17  ;;  %v534_v39 = vsel %vm531_vm4, %v528_v35, %v386_v31 }
  0xb5   : > { %v520_v4 = vpop.permute.xlu0 %519  ;;  %v406_v5 = vpop.permute.xlu1 %405 }
  0xb6   : > { %v524_v8 = vsel %vm521_vm10, %v518_v45, %v520_v4  ;;  %vm1245_vm10 = vmand %vm544_vm2, %vm545_vm0 }
  0xb7   : > { %v597_v9 = vsel %vm588_vm11, %v587_v6, %v524_v8  ;;  %vm1260_vm2 = vmand %vm563_vm7, %vm564_vm9 }
  0xb8   : > { %v616_v10 = vand.u32 %v611_v46, %v597_v9 }
  0xb9   : > { %v404_v14 = vpop.permute.xlu0 %403  ;;  %v402_v15 = vpop.permute.xlu1 %401 }
  0xba   : > { %922 = vmatpush3.bf16.msra.mxu1 %v616_v10  ;;  %v411_v29 = vsel %vm409_vm5, %v404_v14, %v406_v5  ;;  %v410_v11 = vsel %vm409_vm5, %v402_v15, %v404_v14 }
  0xbb   : > { %923 = vmatprep.subr.bf16.mxu1 %v1017_v56  ;;  %v548_v36 = vsel %vm1245_vm10, %v538_v30, %v411_v29  ;;  %v547_v43 = vsel %vm1245_vm10, %v534_v39, %v410_v11 }
  0xbd   : > { %v364_v18 = vpop.permute.xlu0 %363  ;;  %v425_v19 = vpop.permute.xlu1 %424 }
  0xbe   : > { %v368_v13 = vsel %vm365_vm12, %v362_v57, %v364_v18  ;;  %vm605_vm12 = vcmask 220160  }
  0xbf   : > { %v530_v7 = vsel %vm1238_vm3, %v1090_v16, %v368_v13  ;;  %v598_v16 = vld [vmem:[%s1320_s2] sm:$0xf] }
  0xc1   : > { %v423_v20 = vpop.permute.xlu0 %422  ;;  %v421_v21 = vpop.permute.xlu1 %420 }
  0xc2   : > { %v430_v32 = vsel %vm428_vm6, %v423_v20, %v425_v19  ;;  %v429_v37 = vsel %vm428_vm6, %v421_v21, %v423_v20 }
  0xc3   : > { %v557_v42 = vsel %vm550_vm8, %v548_v36, %v430_v32  ;;  %v553_v49 = vsel %vm550_vm8, %v547_v43, %v429_v37 }
  0xc5   : > { %v384_v28 = vpop.permute.xlu0 %383  ;;  %v408_v56 = vpop.permute.xlu1 %407 }
  0xc6   : > { %v388_v38 = vsel %vm385_vm15, %v382_v61, %v384_v28  ;;  %v412_v47 = vsel %vm409_vm5, %v406_v5, %v408_v56 }
  0xc7   : > { %v542_v46 = vsel %vm531_vm4, %v530_v7, %v388_v38  ;;  %vm699_vm4 = vcmask 1046528  }
  0xc8   : > { %v549_v52 = vsel %vm1245_vm10, %v542_v46, %v412_v47 }
  0xc9   : > { %v969_v34 = vpop.permute.xlu0 %968  ;;  %v427_v40 = vpop.permute.xlu1 %426 }
  0xca   : > { %v971_v27 = vunpack.i.h.bf16 %v969_v34  ;;  %v970_v33 = vunpack.i.l.bf16 %v969_v34  ;;  %v431_v50 = vsel %vm428_vm6, %v425_v19, %v427_v40 }
  0xcb   : > { %v561_v55 = vsel %vm550_vm8, %v549_v52, %v431_v50  ;;  %vm782_vm8 = vcmask 1047556  }
  0xcc   : > { %v458_v41 = vsel %vm456_vm1, %v970_v33, %v971_v27  ;;  %vm783_vm14 = vmand %vm782_vm8, %vm564_vm9 }
  0xcd   : > { %v441_v44 = vpop.permute.xlu0 %440  ;;  %v567_v45 = vsel %vm1260_vm2, %v557_v42, %v458_v41 }
  0xce   : > { %v457_v48 = vsel %vm456_vm1, %v441_v44, %v970_v33  ;;  %632 = vmatprep.subr.bf16.mxu0 %v567_v45 }
  0xcf   : > { %v566_v51 = vsel %vm1260_vm2, %v553_v49, %v457_v48 }
  0xd0   : > { %633 = vmatpush1.bf16.msra.mxu0 %v566_v51 }
  0xd1   : > { %v447_v53 = vpop.permute.xlu0 %446 }
  0xd2   : > { %v459_v54 = vsel %vm456_vm1, %v971_v27, %v447_v53  ;;  %vm780_vm1 = vsmask.f32 3328 }
  0xd3   : > { %906 = vmatmul.mubr.msk.bf16.vlgmr.msra.gmra.mxu0 %vm605_vm12, %v598_v16  ;;  %v568_v57 = vsel %vm1260_vm2, %v561_v55, %v459_v54  ;;  %vm781_vm13 = vmand %vm588_vm11, %vm780_vm1 }
  0xd4   : > { %924 = vmatpush3.bf16.msra.mxu1 %v568_v57  ;;  %vm784_vm15 = vmor %vm783_vm14, %vm781_vm13 }
  0xd6   : > { %v603_v58 = vpop.permute.xlu1 %602 }
  0xd7   : > { %926 = vmatmul.mubr.msk.bf16.vlgmr.msra.gmra.mxu1 %vm605_vm12, %v598_v16 }
 0x193   : > { %v652_v59 = vpop.f32.mrf.mxu0 }
 0x194   : > { %v653_v60 = vadd.f32 %v652_v59, %v603_v58 }
 0x195   : > { %v654_v61 = vpop.f32.mrf.mxu0 }
 0x196   : > { %v700_v62 = vsel %vm699_vm4, %v653_v60, -inf  ;;  %v655_v63 = vadd.f32 %v654_v61, %v603_v58 }
 0x197   : > { %v701_v0 = vrot.slane %v700_v62, 4  ;;  %v656_v1 = vpop.f32.mrf.mxu0  ;;  %v693_v2 = vpop.f32.mrf.mxu1 }
 0x198   : > { %v707_v3 = vsel %vm699_vm4, %v655_v63, -inf  ;;  %v694_v4 = vadd.f32 %v693_v2, %v603_v58 }
 0x199   : > { %v702_v5 = vmax.f32 %v700_v62, %v701_v0  ;;  %v708_v6 = vrot.slane %v707_v3, 4  ;;  %v657_v8 = vpop.f32.mrf.mxu0  ;;  %v927_v9 = vpop.f32.mrf.mxu1 }
 0x19a   : > { %v714_v10 = vsel %vm699_vm4, %v694_v4, -inf  ;;  %v788_v8 = vld [vmem:[%s300_s20 + $0x8] sm:$0xf] }
 0x19b   : > { %v703_v14 = vrot.slane %v702_v5, 2  ;;  %v709_v15 = vmax.f32 %v707_v3, %v708_v6  ;;  %v715_v18 = vrot.slane %v714_v10, 4  ;;  %v696_v19 = vpop.f32.mrf.mxu1 }
 0x19d   : > { %v704_v20 = vmax.f32 %v702_v5, %v703_v14  ;;  %v710_v21 = vrot.slane %v709_v15, 2  ;;  %v716_v23 = vmax.f32 %v714_v10, %v715_v18  ;;  %v928_v26 = vpop.f32.mrf.mxu1 }
 0x19f   : > { %v705_v28 = vrot.slane %v704_v20, 1  ;;  %v711_v17 = vmax.f32 %v709_v15, %v710_v21  ;;  %v717_v56 = vrot.slane %v716_v23, 2 }
 0x1a1   : > { %v706_v22 = vmax.f32 %v704_v20, %v705_v28  ;;  %v712_v24 = vrot.slane %v711_v17, 1  ;;  %v718_v25 = vmax.f32 %v716_v23, %v717_v56 }
 0x1a3   : > { %v721_v29 = vsub.f32 %v653_v60, %v706_v22  ;;  %v713_v30 = vmax.f32 %v711_v17, %v712_v24  ;;  %v719_v31 = vrot.slane %v718_v25, 1 }
 0x1a5   : > { %v724_v32 = vpack.c.bf16 %v721_v29, %v721_v29  ;;  %v722_v34 = vsub.f32 %v655_v63, %v713_v30  ;;  %v720_v11 = vmax.f32 %v718_v25, %v719_v31 }
 0x1a7   : > { %v728_v13 = vmul.bf16 1069105081, %v724_v32  ;;  %v725_v27 = vpack.c.bf16 %v722_v34, %v722_v34  ;;  %v723_v33 = vsub.f32 %v694_v4, %v720_v11  ;;  %v785_v4 = vld [vmem:[%s300_s20] sm:$0xff] }
 0x1a9   : > { %975 = vpow.bf16 %v728_v13  ;;  %v731_v12 = vmul.bf16 1069105081, %v725_v27  ;;  %v726_v35 = vpack.c.bf16 %v723_v33, %v723_v33 }
 0x1ab   : > { %977 = vpow.bf16 %v731_v12  ;;  %v734_v36 = vmul.bf16 1069105081, %v726_v35 }
 0x1ad   : > { %979 = vpow.bf16 %v734_v36 }
 0x1b7   : > { %v976_v37 = vpop.eup %975 }
 0x1b8   : > { %v736_v38 = vunpack.c.l.bf16 %v976_v37 }
 0x1b9   : > { %v978_v39 = vpop.eup %977 }
 0x1ba   : > { %v739_v40 = vsel %vm699_vm4, %v736_v38, 0.0  ;;  %v737_v41 = vunpack.c.l.bf16 %v978_v39 }
 0x1bb   : > { %v980_v42 = vpop.eup %979  ;;  %v740_v43 = vrot.slane %v739_v40, 4 }
 0x1bc   : > { %v746_v7 = vsel %vm699_vm4, %v737_v41, 0.0  ;;  %v738_v44 = vunpack.c.l.bf16 %v980_v42 }
 0x1bd   : > { %v741_v45 = vadd.f32 %v740_v43, %v739_v40  ;;  %v747_v46 = vrot.slane %v746_v7, 4 }
 0x1be   : > { %v753_v47 = vsel %vm699_vm4, %v738_v44, 0.0 }
 0x1bf   : > { %v742_v48 = vrot.slane %v741_v45, 2  ;;  %v748_v49 = vadd.f32 %v747_v46, %v746_v7  ;;  %v754_v50 = vrot.slane %v753_v47, 4 }
 0x1c1   : > { %v743_v51 = vadd.f32 %v742_v48, %v741_v45  ;;  %v749_v16 = vrot.slane %v748_v49, 2  ;;  %v755_v52 = vadd.f32 %v754_v50, %v753_v47 }
 0x1c3   : > { %v744_v53 = vrot.slane %v743_v51, 1  ;;  %v750_v54 = vadd.f32 %v749_v16, %v748_v49  ;;  %v756_v55 = vrot.slane %v755_v52, 2 }
 0x1c5   : > { %v745_v57 = vadd.f32 %v744_v53, %v743_v51  ;;  %v751_v58 = vrot.slane %v750_v54, 1  ;;  %v757_v59 = vadd.f32 %v756_v55, %v755_v52 }
 0x1c7   : > { %981 = vrcp.f32 %v745_v57  ;;  %v752_v60 = vadd.f32 %v751_v58, %v750_v54  ;;  %v758_v61 = vrot.slane %v757_v59, 1 }
 0x1c9   : > { %983 = vrcp.f32 %v752_v60  ;;  %v759_v62 = vadd.f32 %v758_v61, %v757_v59 }
 0x1cb   : > { %985 = vrcp.f32 %v759_v62 }
 0x1d4   : > { %v982_v63 = vpop.eup %981 }
 0x1d5   : > { %v763_v1 = vmul.f32 %v982_v63, %v736_v38 }
 0x1d6   : > { %v984_v0 = vpop.eup %983 }
 0x1d7   : > { %v764_v2 = vmul.f32 %v984_v0, %v737_v41 }
 0x1d8   : > { %v986_v3 = vpop.eup %985 }
 0x1d9   : > { %v915_v5 = vpack.c.bf16 %v764_v2, %v763_v1  ;;  %v765_v6 = vmul.f32 %v986_v3, %v738_v44 }
 0x1db   : > { %v786_v9 = vsel %vm784_vm15, %v915_v5, %v785_v4  ;;  %v916_v10 = vpack.c.bf16 %v765_v6, %v765_v6 }
 0x1dc   : > { %787 = vst [vmem:[%s300_s20] sm:$0xff] %v786_v9 }
 0x1dd   : > { %v789_v14 = vsel %vm781_vm13, %v916_v10, %v788_v8 }
 0x1de   : > { %790 = vst [vmem:[%s300_s20 + $0x8] sm:$0xf] %v789_v14 }
 0x1df PF: > { %s14_s17 = sadd.s32 1, %s1009_s17   ;;  %s1331_s15 = smov %s1005_s16 }
 0x1e0   : > { %p11_p5 = scmp.ge.s32.totalorder %s14_s17, 4   ;;  %s1332_s16 = smov %s1334_s18 }
 0x1e2   :  { %13 = sbr.rel (!%p11_p5) target bundleno = 2 (0x2), region = 69 }

</bundles_post_ra>
